<compile_context>
chip_gen: v7x
topology: tpu7x:2x2x1
jax: 0.10.0
libtpu: 0.0.40
codegen_flags: <defaults>
</compile_context>

<pallas_src>
import jax
import jax.numpy as jnp
from jax.experimental import pallas as pl
from jax.experimental.pallas import tpu as pltpu

INPUT_DIM = 2
HIDDEN_DIM = 64


def _round_up(n, m):
    return ((n + m - 1) // m) * m


def mlp_kernel(xT_ref, tT_ref,
               w1_ref, b1_ref,
               w2_ref, b2_ref,
               w3_ref, b3_ref,
               w4_ref, b4_ref,
               w5_ref, b5_ref,
               oT_ref):
    """One batch tile; activations are (features, TILE_B)."""
    # ---- layer 1: fused hstack([x, t]) @ W1^T + b1, done on the VPU in f32 ----
    h = (w1_ref[:, 0:1] * xT_ref[0:1, :]        # (64,1)*(1,TB) -> (64,TB)
         + w1_ref[:, 1:2] * xT_ref[1:2, :]
         + w1_ref[:, 2:3] * tT_ref[...]
         + b1_ref[...])
    h = jnp.maximum(h, 0.0)                      # (64, TB) f32

    # ---- hidden layers: bf16 MXU matmul, f32 accumulate / bias / ReLU ----
    def dense_relu(h_f32, w_ref, b_ref):
        y = jnp.dot(w_ref[...], h_f32.astype(jnp.bfloat16),
                    preferred_element_type=jnp.float32) + b_ref[...]
        return jnp.maximum(y, 0.0)

    h = dense_relu(h, w2_ref, b2_ref)
    h = dense_relu(h, w3_ref, b3_ref)
    h = dense_relu(h, w4_ref, b4_ref)

    # ---- output layer: (2,64) @ (64,TB) -> (2,TB), lane-dense store ----
    oT_ref[...] = (jnp.dot(w5_ref[...], h.astype(jnp.bfloat16),
                           preferred_element_type=jnp.float32)
                   + b5_ref[...]).astype(oT_ref.dtype)


def init_params(key, input_dim=INPUT_DIM, hidden_dim=HIDDEN_DIM):
    """nn.Linear-style init. Weights kept in PyTorch (out_features, in_features)
    layout; biases stored as (out_features, 1)."""
    dims = [input_dim + 1, hidden_dim, hidden_dim, hidden_dim, hidden_dim, input_dim]
    params = []
    for i in range(len(dims) - 1):
        fan_in, fan_out = dims[i], dims[i + 1]
        key, kw, kb = jax.random.split(key, 3)
        bound = 1.0 / float(fan_in) ** 0.5
        w = jax.random.uniform(kw, (fan_out, fan_in), jnp.float32, -bound, bound)
        b = jax.random.uniform(kb, (fan_out, 1), jnp.float32, -bound, bound)
        params.append((w, b))
    return params


def simple_nn_forward(x, t, params, tile_b=512):
    """x: (B, input_dim), t: (B, 1) -> (B, input_dim). tile_b: multiple of 128."""
    assert tile_b % 128 == 0
    (w1, b1), (w2, b2), (w3, b3), (w4, b4), (w5, b5) = params
    B = x.shape[0]

    tb = min(tile_b, _round_up(B, 128))          # lane-dim tile, multiple of 128
    B_pad = _round_up(B, tb)
    grid = (B_pad // tb,)

    # batch-on-lanes: (features, batch); pad batch up to the tile boundary.
    xT = jnp.pad(x.astype(jnp.float32), ((0, B_pad - B), (0, 0))).T   # (2, B_pad)
    tT = jnp.pad(t.astype(jnp.float32), ((0, B_pad - B), (0, 0))).T   # (1, B_pad)

    # bf16 weights for the MXU layers; layer-1 weights stay f32 (VPU path).
    args = (xT, tT,
            w1, b1,
            w2.astype(jnp.bfloat16), b2,
            w3.astype(jnp.bfloat16), b3,
            w4.astype(jnp.bfloat16), b4,
            w5.astype(jnp.bfloat16), b5)

    def act_spec(a):     # batch-tiled activation input
        return pl.BlockSpec((a.shape[0], tb), lambda i: (0, i))

    def res_spec(a):     # VMEM-resident parameter (constant block index -> no re-DMA)
        return pl.BlockSpec(a.shape, lambda i: (0, 0))

    in_specs = [act_spec(xT), act_spec(tT)] + [res_spec(a) for a in args[2:]]
    out_spec = pl.BlockSpec((INPUT_DIM, tb), lambda i: (0, i))

    hid = w2.shape[0]
    flops = 2 * B_pad * ((INPUT_DIM + 1) * hid + 3 * hid * hid + hid * INPUT_DIM)
    bytes_accessed = (int(xT.size) + int(tT.size) + B_pad * INPUT_DIM) * 4 \
        + sum(int(a.size) * a.dtype.itemsize for a in args[2:])

    oT = pl.pallas_call(
        mlp_kernel,
        out_shape=jax.ShapeDtypeStruct((INPUT_DIM, B_pad), jnp.float32),
        grid=grid,
        in_specs=in_specs,
        out_specs=out_spec,
        compiler_params=pltpu.CompilerParams(
            dimension_semantics=("parallel",)),
        cost_estimate=pl.CostEstimate(flops=flops, transcendentals=0,
                                      bytes_accessed=bytes_accessed),
    )(*args)

    return oT.T[:B]      # back to (B, input_dim)


def reference_forward(x, t, params):
    """Pure-JAX f32 reference matching the PyTorch module."""
    h = jnp.hstack([x, t]).astype(jnp.float32)
    for i, (w, b) in enumerate(params):
        h = h @ w.T + b[:, 0]
        if i < len(params) - 1:
            h = jnp.maximum(h, 0.0)
    return h


if __name__ == "__main__":
    key = jax.random.PRNGKey(0)
    k_params, k_x, k_t, k_x2, k_t2 = jax.random.split(key, 5)

    params = init_params(k_params)

    # Small demo batch (grid = 1 tile).
    batch = 8
    x = jax.random.normal(k_x, (batch, INPUT_DIM), jnp.float32)
    t = jax.random.uniform(k_t, (batch, 1), jnp.float32)

    fwd = jax.jit(simple_nn_forward)
    out = jax.block_until_ready(fwd(x, t, params))
    ref = reference_forward(x, t, params)
    assert out.shape == (batch, INPUT_DIM)
    # Hidden matmuls run in bf16 (f32 accumulation) -> relaxed tolerance vs f32 ref.
    assert jnp.allclose(out, ref, atol=5e-2, rtol=5e-2), "mismatch vs JAX reference"

    # Non-multiple batch exercising the multi-step pipelined grid + padding path.
    batch2 = 300
    x2 = jax.random.normal(k_x2, (batch2, INPUT_DIM), jnp.float32)
    t2 = jax.random.uniform(k_t2, (batch2, 1), jnp.float32)
    out2 = jax.block_until_ready(simple_nn_forward(x2, t2, params, tile_b=128))
    ref2 = reference_forward(x2, t2, params)
    assert out2.shape == (batch2, INPUT_DIM)
    assert jnp.allclose(out2, ref2, atol=5e-2, rtol=5e-2), "mismatch vs ref (tiled)"

    print("KERNEL_OK")
</pallas_src>

<mosaic_0001>
module attributes {stable_mosaic.version = 11 : i64} {
  func.func @mlp_kernel(%arg0: i32, %arg1: memref<2x128xf32, #tpu.memory_space<vmem>>, %arg2: memref<1x128xf32, #tpu.memory_space<vmem>>, %arg3: memref<64x3xf32, #tpu.memory_space<vmem>>, %arg4: memref<64x1xf32, #tpu.memory_space<vmem>>, %arg5: memref<64x64xbf16, #tpu.memory_space<vmem>>, %arg6: memref<64x1xf32, #tpu.memory_space<vmem>>, %arg7: memref<64x64xbf16, #tpu.memory_space<vmem>>, %arg8: memref<64x1xf32, #tpu.memory_space<vmem>>, %arg9: memref<64x64xbf16, #tpu.memory_space<vmem>>, %arg10: memref<64x1xf32, #tpu.memory_space<vmem>>, %arg11: memref<2x64xbf16, #tpu.memory_space<vmem>>, %arg12: memref<2x1xf32, #tpu.memory_space<vmem>>, %arg13: memref<2x128xf32, #tpu.memory_space<vmem>>) attributes {dimension_semantics = [#tpu.dimension_semantics<parallel>], iteration_bounds = array<i64: 1>, scalar_prefetch = 0 : i64, scratch_operands = 0 : i64, tpu.core_type = #tpu.core_type<tc>, window_params = [{transform_indices = @transform_0, window_bounds = array<i64: 2, 128>}, {transform_indices = @transform_1, window_bounds = array<i64: 1, 128>}, {pipeline_mode = #tpu.pipeline_mode<synchronous>, transform_indices = @transform_2, window_bounds = array<i64: 64, 3>}, {pipeline_mode = #tpu.pipeline_mode<synchronous>, transform_indices = @transform_3, window_bounds = array<i64: 64, 1>}, {pipeline_mode = #tpu.pipeline_mode<synchronous>, transform_indices = @transform_4, window_bounds = array<i64: 64, 64>}, {pipeline_mode = #tpu.pipeline_mode<synchronous>, transform_indices = @transform_5, window_bounds = array<i64: 64, 1>}, {pipeline_mode = #tpu.pipeline_mode<synchronous>, transform_indices = @transform_6, window_bounds = array<i64: 64, 64>}, {pipeline_mode = #tpu.pipeline_mode<synchronous>, transform_indices = @transform_7, window_bounds = array<i64: 64, 1>}, {pipeline_mode = #tpu.pipeline_mode<synchronous>, transform_indices = @transform_8, window_bounds = array<i64: 64, 64>}, {pipeline_mode = #tpu.pipeline_mode<synchronous>, transform_indices = @transform_9, window_bounds = array<i64: 64, 1>}, {pipeline_mode = #tpu.pipeline_mode<synchronous>, transform_indices = @transform_10, window_bounds = array<i64: 2, 64>}, {pipeline_mode = #tpu.pipeline_mode<synchronous>, transform_indices = @transform_11, window_bounds = array<i64: 2, 1>}, {transform_indices = @transform_12, window_bounds = array<i64: 2, 128>}]} {
    %c0 = arith.constant 0 : index
    %c0_0 = arith.constant 0 : index
    %0 = vector.load %arg3[%c0, %c0_0] : memref<64x3xf32, #tpu.memory_space<vmem>>, vector<64x1xf32>
    %c0_1 = arith.constant 0 : index
    %c0_2 = arith.constant 0 : index
    %1 = vector.load %arg1[%c0_1, %c0_2] : memref<2x128xf32, #tpu.memory_space<vmem>>, vector<1x128xf32>
    %2 = vector.broadcast %0 : vector<64x1xf32> to vector<64x128xf32>
    %3 = vector.broadcast %1 : vector<1x128xf32> to vector<64x128xf32>
    %4 = arith.mulf %2, %3 : vector<64x128xf32>
    %c0_3 = arith.constant 0 : index
    %c1 = arith.constant 1 : index
    %5 = vector.load %arg3[%c0_3, %c1] : memref<64x3xf32, #tpu.memory_space<vmem>>, vector<64x1xf32>
    %c1_4 = arith.constant 1 : index
    %c0_5 = arith.constant 0 : index
    %6 = vector.load %arg1[%c1_4, %c0_5] : memref<2x128xf32, #tpu.memory_space<vmem>>, vector<1x128xf32>
    %7 = vector.broadcast %5 : vector<64x1xf32> to vector<64x128xf32>
    %8 = vector.broadcast %6 : vector<1x128xf32> to vector<64x128xf32>
    %9 = arith.mulf %7, %8 : vector<64x128xf32>
    %10 = arith.addf %4, %9 : vector<64x128xf32>
    %c0_6 = arith.constant 0 : index
    %c2 = arith.constant 2 : index
    %11 = vector.load %arg3[%c0_6, %c2] : memref<64x3xf32, #tpu.memory_space<vmem>>, vector<64x1xf32>
    %c0_7 = arith.constant 0 : index
    %c0_8 = arith.constant 0 : index
    %12 = vector.load %arg2[%c0_7, %c0_8] : memref<1x128xf32, #tpu.memory_space<vmem>>, vector<1x128xf32>
    %13 = vector.broadcast %11 : vector<64x1xf32> to vector<64x128xf32>
    %14 = vector.broadcast %12 : vector<1x128xf32> to vector<64x128xf32>
    %15 = arith.mulf %13, %14 : vector<64x128xf32>
    %16 = arith.addf %10, %15 : vector<64x128xf32>
    %c0_9 = arith.constant 0 : index
    %c0_10 = arith.constant 0 : index
    %17 = vector.load %arg4[%c0_9, %c0_10] : memref<64x1xf32, #tpu.memory_space<vmem>>, vector<64x1xf32>
    %18 = vector.broadcast %17 : vector<64x1xf32> to vector<64x128xf32>
    %19 = arith.addf %16, %18 : vector<64x128xf32>
    %cst = arith.constant 0.000000e+00 : f32
    %20 = vector.broadcast %cst : f32 to vector<64x128xf32>
    %21 = arith.maximumf %19, %20 : vector<64x128xf32>
    %c0_11 = arith.constant 0 : index
    %c0_12 = arith.constant 0 : index
    %22 = vector.load %arg5[%c0_11, %c0_12] : memref<64x64xbf16, #tpu.memory_space<vmem>>, vector<64x64xbf16>
    %23 = arith.truncf %21 : vector<64x128xf32> to vector<64x128xbf16>
    %cst_13 = arith.constant dense<0.000000e+00> : vector<64x128xf32>
    %24 = tpu.matmul %22, %23, %cst_13 {dimension_numbers = #tpu.dot_dimension_numbers<[1], [0], [0], [1], [0, 0, 1, 1], [], []>} : vector<64x64xbf16>, vector<64x128xbf16>, vector<64x128xf32> -> vector<64x128xf32>
    %c0_14 = arith.constant 0 : index
    %c0_15 = arith.constant 0 : index
    %25 = vector.load %arg6[%c0_14, %c0_15] : memref<64x1xf32, #tpu.memory_space<vmem>>, vector<64x1xf32>
    %26 = vector.broadcast %25 : vector<64x1xf32> to vector<64x128xf32>
    %27 = arith.addf %24, %26 : vector<64x128xf32>
    %cst_16 = arith.constant 0.000000e+00 : f32
    %28 = vector.broadcast %cst_16 : f32 to vector<64x128xf32>
    %29 = arith.maximumf %27, %28 : vector<64x128xf32>
    %c0_17 = arith.constant 0 : index
    %c0_18 = arith.constant 0 : index
    %30 = vector.load %arg7[%c0_17, %c0_18] : memref<64x64xbf16, #tpu.memory_space<vmem>>, vector<64x64xbf16>
    %31 = arith.truncf %29 : vector<64x128xf32> to vector<64x128xbf16>
    %cst_19 = arith.constant dense<0.000000e+00> : vector<64x128xf32>
    %32 = tpu.matmul %30, %31, %cst_19 {dimension_numbers = #tpu.dot_dimension_numbers<[1], [0], [0], [1], [0, 0, 1, 1], [], []>} : vector<64x64xbf16>, vector<64x128xbf16>, vector<64x128xf32> -> vector<64x128xf32>
    %c0_20 = arith.constant 0 : index
    %c0_21 = arith.constant 0 : index
    %33 = vector.load %arg8[%c0_20, %c0_21] : memref<64x1xf32, #tpu.memory_space<vmem>>, vector<64x1xf32>
    %34 = vector.broadcast %33 : vector<64x1xf32> to vector<64x128xf32>
    %35 = arith.addf %32, %34 : vector<64x128xf32>
    %cst_22 = arith.constant 0.000000e+00 : f32
    %36 = vector.broadcast %cst_22 : f32 to vector<64x128xf32>
    %37 = arith.maximumf %35, %36 : vector<64x128xf32>
    %c0_23 = arith.constant 0 : index
    %c0_24 = arith.constant 0 : index
    %38 = vector.load %arg9[%c0_23, %c0_24] : memref<64x64xbf16, #tpu.memory_space<vmem>>, vector<64x64xbf16>
    %39 = arith.truncf %37 : vector<64x128xf32> to vector<64x128xbf16>
    %cst_25 = arith.constant dense<0.000000e+00> : vector<64x128xf32>
    %40 = tpu.matmul %38, %39, %cst_25 {dimension_numbers = #tpu.dot_dimension_numbers<[1], [0], [0], [1], [0, 0, 1, 1], [], []>} : vector<64x64xbf16>, vector<64x128xbf16>, vector<64x128xf32> -> vector<64x128xf32>
    %c0_26 = arith.constant 0 : index
    %c0_27 = arith.constant 0 : index
    %41 = vector.load %arg10[%c0_26, %c0_27] : memref<64x1xf32, #tpu.memory_space<vmem>>, vector<64x1xf32>
    %42 = vector.broadcast %41 : vector<64x1xf32> to vector<64x128xf32>
    %43 = arith.addf %40, %42 : vector<64x128xf32>
    %cst_28 = arith.constant 0.000000e+00 : f32
    %44 = vector.broadcast %cst_28 : f32 to vector<64x128xf32>
    %45 = arith.maximumf %43, %44 : vector<64x128xf32>
    %c0_29 = arith.constant 0 : index
    %c0_30 = arith.constant 0 : index
    %46 = vector.load %arg11[%c0_29, %c0_30] : memref<2x64xbf16, #tpu.memory_space<vmem>>, vector<2x64xbf16>
    %47 = arith.truncf %45 : vector<64x128xf32> to vector<64x128xbf16>
    %cst_31 = arith.constant dense<0.000000e+00> : vector<2x128xf32>
    %48 = tpu.matmul %46, %47, %cst_31 {dimension_numbers = #tpu.dot_dimension_numbers<[1], [0], [0], [1], [0, 0, 1, 1], [], []>} : vector<2x64xbf16>, vector<64x128xbf16>, vector<2x128xf32> -> vector<2x128xf32>
    %c0_32 = arith.constant 0 : index
    %c0_33 = arith.constant 0 : index
    %49 = vector.load %arg12[%c0_32, %c0_33] : memref<2x1xf32, #tpu.memory_space<vmem>>, vector<2x1xf32>
    %50 = vector.broadcast %49 : vector<2x1xf32> to vector<2x128xf32>
    %51 = arith.addf %48, %50 : vector<2x128xf32>
    %c0_34 = arith.constant 0 : index
    %c0_35 = arith.constant 0 : index
    %52 = vector.load %arg13[%c0_34, %c0_35] : memref<2x128xf32, #tpu.memory_space<vmem>>, vector<2x128xf32>
    tpu.vector_store %arg13[%c0_34, %c0_35], %51 {strides = array<i32>} : memref<2x128xf32, #tpu.memory_space<vmem>>, vector<2x128xf32>,
    return
  }
  func.func @transform_0(%arg0: i32) -> (i32, i32) {
    %c0_i32 = arith.constant 0 : i32
    %c0_i32_0 = arith.constant 0 : i32
    return %c0_i32, %arg0 : i32, i32
  }
  func.func @transform_1(%arg0: i32) -> (i32, i32) {
    %c0_i32 = arith.constant 0 : i32
    %c0_i32_0 = arith.constant 0 : i32
    return %c0_i32, %arg0 : i32, i32
  }
  func.func @transform_2(%arg0: i32) -> (i32, i32) {
    %c0_i32 = arith.constant 0 : i32
    %c0_i32_0 = arith.constant 0 : i32
    %c0_i32_1 = arith.constant 0 : i32
    return %c0_i32, %c0_i32_0 : i32, i32
  }
  func.func @transform_3(%arg0: i32) -> (i32, i32) {
    %c0_i32 = arith.constant 0 : i32
    %c0_i32_0 = arith.constant 0 : i32
    %c0_i32_1 = arith.constant 0 : i32
    return %c0_i32, %c0_i32_0 : i32, i32
  }
  func.func @transform_4(%arg0: i32) -> (i32, i32) {
    %c0_i32 = arith.constant 0 : i32
    %c0_i32_0 = arith.constant 0 : i32
    %c0_i32_1 = arith.constant 0 : i32
    return %c0_i32, %c0_i32_0 : i32, i32
  }
  func.func @transform_5(%arg0: i32) -> (i32, i32) {
    %c0_i32 = arith.constant 0 : i32
    %c0_i32_0 = arith.constant 0 : i32
    %c0_i32_1 = arith.constant 0 : i32
    return %c0_i32, %c0_i32_0 : i32, i32
  }
  func.func @transform_6(%arg0: i32) -> (i32, i32) {
    %c0_i32 = arith.constant 0 : i32
    %c0_i32_0 = arith.constant 0 : i32
    %c0_i32_1 = arith.constant 0 : i32
    return %c0_i32, %c0_i32_0 : i32, i32
  }
  func.func @transform_7(%arg0: i32) -> (i32, i32) {
    %c0_i32 = arith.constant 0 : i32
    %c0_i32_0 = arith.constant 0 : i32
    %c0_i32_1 = arith.constant 0 : i32
    return %c0_i32, %c0_i32_0 : i32, i32
  }
  func.func @transform_8(%arg0: i32) -> (i32, i32) {
    %c0_i32 = arith.constant 0 : i32
    %c0_i32_0 = arith.constant 0 : i32
    %c0_i32_1 = arith.constant 0 : i32
    return %c0_i32, %c0_i32_0 : i32, i32
  }
  func.func @transform_9(%arg0: i32) -> (i32, i32) {
    %c0_i32 = arith.constant 0 : i32
    %c0_i32_0 = arith.constant 0 : i32
    %c0_i32_1 = arith.constant 0 : i32
    return %c0_i32, %c0_i32_0 : i32, i32
  }
  func.func @transform_10(%arg0: i32) -> (i32, i32) {
    %c0_i32 = arith.constant 0 : i32
    %c0_i32_0 = arith.constant 0 : i32
    %c0_i32_1 = arith.constant 0 : i32
    return %c0_i32, %c0_i32_0 : i32, i32
  }
  func.func @transform_11(%arg0: i32) -> (i32, i32) {
    %c0_i32 = arith.constant 0 : i32
    %c0_i32_0 = arith.constant 0 : i32
    %c0_i32_1 = arith.constant 0 : i32
    return %c0_i32, %c0_i32_0 : i32, i32
  }
  func.func @transform_12(%arg0: i32) -> (i32, i32) {
    %c0_i32 = arith.constant 0 : i32
    %c0_i32_0 = arith.constant 0 : i32
    return %c0_i32, %arg0 : i32, i32
  }
}

</mosaic_0001>

<bundles_post_ra>
// kernel: simple_nn_forward.1
= control target key start
LH: loop header
LB: loop body
LE: loop exit
PB: predicated region body
PF: predicated region fallthrough
CT: control target
= control target key end

     0   :  { %v1015_v1 = vmov 2   ;;  %v1016_v2 = vmov 1   ;;  %v1017_v7 = vmov 0   ;;  %s1328_s0 = inlined_call_operand.vmem [shape: f32[2,128], index: 0, kind: input, shape index: {}]   ;;  %s1329_s1 = inlined_call_operand.vmem [shape: f32[1,128], index: 1, kind: input, shape index: {}]   ;;  %s1330_s2 = inlined_call_operand.vmem [shape: f32[64,3], index: 2, kind: input, shape index: {}]   ;;  %s1331_s3 = inlined_call_operand.vmem [shape: f32[64,1], index: 3, kind: input, shape index: {}]   ;;  %s1332_s4 = inlined_call_operand.vmem [shape: bf16[64,64], index: 4, kind: input, shape index: {}]   ;;  %s1333_s5 = inlined_call_operand.vmem [shape: f32[64,1], index: 5, kind: input, shape index: {}]   ;;  %s1334_s6 = inlined_call_operand.vmem [shape: bf16[64,64], index: 6, kind: input, shape index: {}]   ;;  %s1335_s7 = inlined_call_operand.vmem [shape: f32[64,1], index: 7, kind: input, shape index: {}]   ;;  %s1336_s8 = inlined_call_operand.vmem [shape: bf16[64,64], index: 8, kind: input, shape index: {}]   ;;  %s1337_s9 = inlined_call_operand.vmem [shape: f32[64,1], index: 9, kind: input, shape index: {}]   ;;  %s1338_s10 = inlined_call_operand.vmem [shape: bf16[2,64], index: 10, kind: input, shape index: {}]   ;;  %s1339_s11 = inlined_call_operand.vmem [shape: f32[2,1], index: 11, kind: input, shape index: {}]   ;;  %s1340_s12 = inlined_call_operand.hbm [shape: f32[2,128], index: 12, kind: output, shape index: {}]  }
   0x1   :  { %v43_v0 = vld [vmem:[%s1330_s2] sm:$0xff]  ;;  %965 = vset.pattern.permute.xlu0 %v1015_v1  ;;  %964 = vset.pattern.permute.xlu1 %v1016_v2  ;;  %v45_v3 = vld [vmem:[%s1330_s2 + $0x10] sm:$0xff]  ;;  %v44_v4 = vld [vmem:[%s1330_s2 + $0x8] sm:$0xff] }
   0x2   :  { %159 = vperm.xlu0 %965, %v43_v0   ;;  %106 = vperm.xlu1 %964, %v43_v0   ;;  %v48_v5 = vld [vmem:[%s1330_s2 + $0x28] sm:$0xff]  ;;  %v47_v6 = vld [vmem:[%s1330_s2 + $0x20] sm:$0xff]  ;;  %v50_v8 = vld [vmem:[%s1330_s2 + $0x38] sm:$0xff] }
   0x3   :  { %v46_v9 = vld [vmem:[%s1330_s2 + $0x18] sm:$0xff] }
   0x6   :  { %167 = vperm.xlu0 %965, %v45_v3   ;;  %110 = vperm.xlu1 %964, %v44_v4  }
   0xa   :  { %179 = vperm.xlu0 %965, %v48_v5   ;;  %966 = vset.pattern.permute.xlu1 %v1015_v1 }
   0xb   :  { %163 = vperm.xlu1 %966, %v44_v4  }
   0xe   :  { %973 = vset.pattern.permute.xlu0 %v1016_v2 }
   0xf   :  { %122 = vperm.xlu0 %973, %v47_v6   ;;  %967 = vset.pattern.permute.xlu1 %v1017_v7 }
  0x10   :  { %64 = vperm.xlu1 %967, %v45_v3  }
  0x13   :  { %134 = vperm.xlu0 %973, %v50_v8  }
  0x14   :  { %968 = vset.pattern.permute.xlu1 %v1016_v2 }
  0x15   :  { %114 = vperm.xlu1 %968, %v45_v3  }
  0x16   :  { %17 = vsyncpa [#allocation3], 0  ;;  %v212_v10 = vld [vmem:[%s1331_s3] sm:$0xff]  ;;  %v213_v11 = vld [vmem:[%s1331_s3 + $0x8] sm:$0xff]  ;;  %vm356_vm0 = vcmask 523264   ;;  %vm1019_vm1 = vmmov 0  }
  0x17   :  { %976 = vset.pattern.permute.xlu0 %v1017_v7  ;;  %v49_v12 = vld [vmem:[%s1330_s2 + $0x30] sm:$0xff]  ;;  %v216_v13 = vld [vmem:[%s1331_s3 + $0x20] sm:$0xff]  ;;  %v219_v14 = vld [vmem:[%s1331_s3 + $0x38] sm:$0xff]  ;;  %s1020_s27 = smov [#allocation2]  }
  0x18   :  { %54 = vperm.xlu0 %976, %v43_v0   ;;  %v289_v15 = vld [vmem:[%s1333_s5 + $0x8] sm:$0xff]  ;;  %v291_v16 = vld [vmem:[%s1333_s5 + $0x18] sm:$0xff]  ;;  %v214_v17 = vld [vmem:[%s1331_s3 + $0x10] sm:$0xff] }
  0x19   :  { %118 = vperm.xlu1 %968, %v46_v9   ;;  %v293_v18 = vld [vmem:[%s1333_s5 + $0x28] sm:$0xff]  ;;  %v215_v19 = vld [vmem:[%s1331_s3 + $0x18] sm:$0xff]  ;;  %v218_v28 = vld [vmem:[%s1331_s3 + $0x30] sm:$0xff] }
  0x1a   :  { %v295_v20 = vld [vmem:[%s1333_s5 + $0x38] sm:$0xff]  ;;  %v455_v21 = vld [vmem:[%s1335_s7 + $0x8] sm:$0xff]  ;;  %v288_v30 = vld [vmem:[%s1333_s5] sm:$0xff] }
  0x1b   :  { %v457_v22 = vld [vmem:[%s1335_s7 + $0x18] sm:$0xff]  ;;  %v459_v23 = vld [vmem:[%s1335_s7 + $0x28] sm:$0xff]  ;;  %v290_v32 = vld [vmem:[%s1333_s5 + $0x10] sm:$0xff] }
  0x1c   :  { %59 = vperm.xlu0 %976, %v44_v4   ;;  %v461_v24 = vld [vmem:[%s1335_s7 + $0x38] sm:$0xff]  ;;  %v620_v25 = vld [vmem:[%s1337_s9 + $0x8] sm:$0xff]  ;;  %v979_v33 = vld [vmem:[%s1332_s4] sm:$0xff]  }
  0x1d   :  { %969 = vset.pattern.permute.xlu1 %v1015_v1  ;;  %v217_v26 = vld [vmem:[%s1331_s3 + $0x28] sm:$0xff]  ;;  %v622_v27 = vld [vmem:[%s1337_s9 + $0x18] sm:$0xff]  ;;  %v292_v34 = vld [vmem:[%s1333_s5 + $0x20] sm:$0xff]  ;;  %906 = vmatprep.mubr.msk.bf16.mxu0 %vm356_vm0, %v979_v33 }
  0x1e   :  { %171 = vperm.xlu1 %969, %v46_v9   ;;  %v624_v29 = vld [vmem:[%s1337_s9 + $0x28] sm:$0xff]  ;;  %v626_v31 = vld [vmem:[%s1337_s9 + $0x38] sm:$0xff]  ;;  %v294_v35 = vld [vmem:[%s1333_s5 + $0x30] sm:$0xff] }
  0x1f   :  { %v454_v36 = vld [vmem:[%s1335_s7] sm:$0xff]  ;;  %v456_v37 = vld [vmem:[%s1335_s7 + $0x10] sm:$0xff] }
  0x20   :  { %69 = vperm.xlu0 %976, %v46_v9   ;;  %v458_v38 = vld [vmem:[%s1335_s7 + $0x20] sm:$0xff]  ;;  %v460_v39 = vld [vmem:[%s1335_s7 + $0x30] sm:$0xff] }
  0x21   :  { %v619_v40 = vld [vmem:[%s1337_s9] sm:$0xff]  ;;  %v621_v41 = vld [vmem:[%s1337_s9 + $0x10] sm:$0xff] }
  0x22   :  { %970 = vset.pattern.permute.xlu1 %v1017_v7  ;;  %v623_v44 = vld [vmem:[%s1337_s9 + $0x20] sm:$0xff]  ;;  %v625_v47 = vld [vmem:[%s1337_s9 + $0x30] sm:$0xff]  ;;  %s833_s9 = sshll.u32 %s1020_s27, 4  ;;  %s834_s9 = int_to_ptr.vmem [resolvable:$true] %s833_s9 }
  0x23   :  { %222 = vperm.xlu1 %970, %v212_v10   ;;  %v777_v50 = vld [vmem:[%s1339_s11] sm:$0x3]  ;;  %s991_s28 = scalar_lea.vmem %s834_s9, 32  ;;  %p996_p1 = scmp.lt.s32.totalorder %s834_s9, %s834_s9 }
  0x24   :  { %227 = vperm.xlu0 %976, %v213_v11   ;;  %v1230_v56 = vld [vmem:[%s1328_s0 + $0x1] ss:$0 sm:$0xff]  ;;  %v1235_v57 = vld [vmem:[%s1328_s0] ss:$0 sm:$0xff]  ;;  %p992_p0 = scmp.ne.s32.totalorder %s834_s9, %s991_s28  ;;  %p997_p2 = scmp.lt.s32.totalorder %s991_s28, %s991_s28 }
  0x25   :  { %v1242_v62 = vld [vmem:[%s1329_s1] ss:$0 sm:$0xff] }
  0x26   :  { %p998_p3 = por %p997_p2, %p996_p1 }
  0x27   :  { %74 = vperm.xlu1 %970, %v47_v6  }
  0x28   :  { %84 = vperm.xlu0 %976, %v49_v12   ;;  %p999_p4 = pnand %p998_p3, %p992_p0 }
  0x2b   :  { %79 = vperm.xlu1 %970, %v48_v5  }
  0x2c   :  { %242 = vperm.xlu0 %976, %v216_v13  }
  0x2f   :  { %971 = vset.pattern.permute.xlu1 %v1016_v2 }
  0x30   :  { %257 = vperm.xlu0 %976, %v219_v14   ;;  %126 = vperm.xlu1 %971, %v48_v5  }
  0x34   :  { %303 = vperm.xlu0 %976, %v289_v15   ;;  %972 = vset.pattern.permute.xlu1 %v1015_v1 }
  0x35   :  { %175 = vperm.xlu1 %972, %v47_v6  }
  0x38   :  { %313 = vperm.xlu0 %976, %v291_v16  }
  0x39   :  { %974 = vset.pattern.permute.xlu1 %v1017_v7 }
  0x3a   :  { %232 = vperm.xlu1 %974, %v214_v17  }
  0x3c   :  { %323 = vperm.xlu0 %976, %v293_v18  }
  0x3e   :  { %237 = vperm.xlu1 %974, %v215_v19  }
  0x40   :  { %333 = vperm.xlu0 %976, %v295_v20  }
  0x42   :  { %89 = vperm.xlu1 %974, %v50_v8  }
  0x44   :  { %469 = vperm.xlu0 %976, %v455_v21  }
  0x46   :  { %975 = vset.pattern.permute.xlu1 %v1016_v2 }
  0x47   :  { %130 = vperm.xlu1 %975, %v49_v12  }
  0x48   :  { %479 = vperm.xlu0 %976, %v457_v22  }
  0x4b   :  { %977 = vset.pattern.permute.xlu1 %v1015_v1 }
  0x4c   :  { %489 = vperm.xlu0 %976, %v459_v23   ;;  %183 = vperm.xlu1 %977, %v49_v12  }
  0x50   :  { %499 = vperm.xlu0 %976, %v461_v24   ;;  %187 = vperm.xlu1 %977, %v50_v8  }
  0x54   :  { %634 = vperm.xlu0 %976, %v620_v25   ;;  %978 = vset.pattern.permute.xlu1 %v1017_v7 }
  0x55   :  { %247 = vperm.xlu1 %978, %v217_v26  }
  0x58   :  { %644 = vperm.xlu0 %976, %v622_v27  }
  0x59   :  { %252 = vperm.xlu1 %978, %v218_v28  }
  0x5c   :  { %654 = vperm.xlu0 %976, %v624_v29  }
  0x5d   :  { %298 = vperm.xlu1 %978, %v288_v30  }
  0x60   :  { %664 = vperm.xlu0 %976, %v626_v31  }
  0x61   :  { %308 = vperm.xlu1 %978, %v290_v32  }
  0x65   :  { %318 = vperm.xlu1 %978, %v292_v34  }
  0x69   :  { %328 = vperm.xlu1 %978, %v294_v35  }
  0x6d   :  { %464 = vperm.xlu1 %978, %v454_v36  }
  0x71   :  { %474 = vperm.xlu1 %978, %v456_v37  }
  0x75   :  { %484 = vperm.xlu1 %978, %v458_v38  }
  0x79   :  { %494 = vperm.xlu1 %978, %v460_v39  }
  0x7d   :  { %629 = vperm.xlu1 %978, %v619_v40  }
  0x81   :  { %639 = vperm.xlu1 %978, %v621_v41   ;;  %v107_v42 = vpop.permute.xlu1 %106  ;;  %v160_v43 = vpop.permute.xlu0 %159 }
  0x82   :  { %v141_v60 = vmul.f32 %v1230_v56, %v107_v42  ;;  %v196_v1 = vmul.f32 %v1242_v62, %v160_v43 }
  0x85   :  { %649 = vperm.xlu1 %978, %v623_v44   ;;  %v111_v45 = vpop.permute.xlu1 %110  ;;  %v168_v46 = vpop.permute.xlu0 %167 }
  0x86   :  { %v142_v63 = vmul.f32 %v1230_v56, %v111_v45  ;;  %v198_v23 = vmul.f32 %v1242_v62, %v168_v46 }
  0x89   :  { %659 = vperm.xlu1 %978, %v625_v47   ;;  %v1220_v48 = vpop.permute.xlu0 %179 }
  0x8a   :  { %v164_v49 = vpop.permute.xlu1 %163 }
  0x8b   :  { %v197_v6 = vmul.f32 %v1242_v62, %v164_v49 }
  0x8d   :  { %780 = vperm.xlu1 %978, %v777_v50  }
  0x8e   :  { %v123_v51 = vpop.permute.xlu0 %122 }
  0x8f   :  { %v65_v52 = vpop.permute.xlu1 %64  ;;  %v145_v39 = vmul.f32 %v1230_v56, %v123_v51 }
  0x90   :  { %v98_v20 = vmul.f32 %v1235_v57, %v65_v52 }
  0x92   :  { %v1225_v53 = vpop.permute.xlu0 %134 }
  0x93   :  { %v148_v49 = vmul.f32 %v1230_v56, %v1225_v53 }
  0x94   :  { %v115_v54 = vpop.permute.xlu1 %114 }
  0x95   :  { %v143_v19 = vmul.f32 %v1230_v56, %v115_v54 }
  0x97   :  { %v55_v55 = vpop.permute.xlu0 %54  ;;  %v151_v24 = vadd.f32 %v143_v19, %v98_v20 }
  0x98   :  { %v119_v58 = vpop.permute.xlu1 %118  ;;  %v96_v59 = vmul.f32 %v1235_v57, %v55_v55 }
  0x99   :  { %v144_v25 = vmul.f32 %v1230_v56, %v119_v58  ;;  %v206_v29 = vadd.f32 %v198_v23, %v151_v24  ;;  %v201_v58 = vmul.f32 %v1242_v62, %v1220_v48 }
  0x9a   :  { %v149_v2 = vadd.f32 %v141_v60, %v96_v59 }
  0x9b   :  { %v60_v61 = vpop.permute.xlu0 %59 }
  0x9c   :  { %v97_v0 = vmul.f32 %v1235_v57, %v60_v61  ;;  %v204_v7 = vadd.f32 %v196_v1, %v149_v2 }
  0x9d   :  { %v172_v3 = vpop.permute.xlu1 %171 }
  0x9e   :  { %v150_v4 = vadd.f32 %v142_v63, %v97_v0  ;;  %v199_v28 = vmul.f32 %v1242_v62, %v172_v3 }
  0x9f   :  { %v70_v5 = vpop.permute.xlu0 %69 }
  0xa0   :  { %v205_v9 = vadd.f32 %v197_v6, %v150_v4  ;;  %v99_v21 = vmul.f32 %v1235_v57, %v70_v5 }
  0xa2   :  { %v223_v8 = vpop.permute.xlu1 %222  ;;  %v152_v26 = vadd.f32 %v144_v25, %v99_v21 }
  0xa3   :  { %v260_v10 = vadd.f32 %v223_v8, %v204_v7  ;;  %v228_v11 = vpop.permute.xlu0 %227 }
  0xa4   :  { %v261_v12 = vadd.f32 %v228_v11, %v205_v9  ;;  %v207_v31 = vadd.f32 %v199_v28, %v152_v26 }
  0xa5   :  { %v268_v13 = vmax.f32 %v260_v10, 0.0 }
  0xa6   :  { %v269_v14 = vmax.f32 %v261_v12, 0.0  ;;  %v75_v15 = vpop.permute.xlu1 %74 }
  0xa7   :  { %v100_v40 = vmul.f32 %v1235_v57, %v75_v15  ;;  %v85_v41 = vpop.permute.xlu0 %84  ;;  %v983_v15 = vld [vmem:[%s1334_s6] sm:$0xff]  }
  0xa8   :  { %v284_v16 = vpack.c.bf16 %v269_v14, %v268_v13  ;;  %v102_v61 = vmul.f32 %v1235_v57, %v85_v41  ;;  %v981_v13 = vld [vmem:[%s1332_s4 + $0x10] sm:$0xff]   ;;  %v982_v14 = vld [vmem:[%s1332_s4 + $0x18] sm:$0xff]   ;;  %922 = vmatprep.mubr.msk.bf16.mxu1 %vm356_vm0, %v983_v15 }
  0xa9   :  { %v153_v45 = vadd.f32 %v145_v39, %v100_v40 }
  0xaa   :  { %898 = vmatprep.subr.bf16.mxu0 %v284_v16  ;;  %v80_v17 = vpop.permute.xlu1 %79 }
  0xab   :  { %899 = vmatpush3.bf16.msra.mxu0 %v284_v16  ;;  %v101_v46 = vmul.f32 %v1235_v57, %v80_v17  ;;  %v243_v51 = vpop.permute.xlu0 %242 }
  0xaf   :  { %v127_v18 = vpop.permute.xlu1 %126  ;;  %v258_v5 = vpop.permute.xlu0 %257 }
  0xb0   :  { %v146_v42 = vmul.f32 %v1230_v56, %v127_v18 }
  0xb2   :  { %v154_v50 = vadd.f32 %v146_v42, %v101_v46 }
  0xb3   :  { %v304_v17 = vpop.permute.xlu0 %303 }
  0xb4   :  { %v176_v22 = vpop.permute.xlu1 %175  ;;  %v209_v2 = vadd.f32 %v201_v58, %v154_v50  ;;  %v986_v58 = vld [vmem:[%s1334_s6 + $0x18] sm:$0xff]  }
  0xb5   :  { %v200_v43 = vmul.f32 %v1242_v62, %v176_v22 }
  0xb7   :  { %v208_v52 = vadd.f32 %v200_v43, %v153_v45  ;;  %v314_v19 = vpop.permute.xlu0 %313 }
  0xb9   :  { %v233_v27 = vpop.permute.xlu1 %232  ;;  %v264_v63 = vadd.f32 %v243_v51, %v208_v52  ;;  %v984_v51 = vld [vmem:[%s1334_s6 + $0x8] sm:$0xff]  }
  0xba   :  { %v262_v30 = vadd.f32 %v233_v27, %v206_v29 }
  0xbb   :  { %v272_v7 = vmax.f32 %v264_v63, 0.0  ;;  %v324_v28 = vpop.permute.xlu0 %323 }
  0xbc   :  { %v270_v34 = vmax.f32 %v262_v30, 0.0 }
  0xbd   :  { %v238_v32 = vpop.permute.xlu1 %237 }
  0xbe   :  { %v263_v33 = vadd.f32 %v238_v32, %v207_v31 }
  0xbf   :  { %v334_v40 = vpop.permute.xlu0 %333 }
  0xc0   :  { %v271_v35 = vmax.f32 %v263_v33, 0.0 }
  0xc1   :  { %v90_v36 = vpop.permute.xlu1 %89 }
  0xc2   :  { %v285_v37 = vpack.c.bf16 %v271_v35, %v270_v34  ;;  %v103_v47 = vmul.f32 %v1235_v57, %v90_v36 }
  0xc4   :  { %900 = vmatprep.subr.bf16.mxu0 %v285_v37  ;;  %v156_v59 = vadd.f32 %v148_v49, %v103_v47 }
  0xc5   :  { %901 = vmatpush3.bf16.msra.mxu0 %v285_v37 }
  0xc6   :  { %v131_v38 = vpop.permute.xlu1 %130 }
  0xc7   :  { %v147_v60 = vmul.f32 %v1230_v56, %v131_v38 }
  0xc9   :  { %v155_v3 = vadd.f32 %v147_v60, %v102_v61  ;;  %v470_v61 = vpop.permute.xlu0 %469 }
  0xcb   :  { %v184_v44 = vpop.permute.xlu1 %183 }
  0xcc   :  { %v202_v0 = vmul.f32 %v1242_v62, %v184_v44 }
  0xce   :  { %v210_v9 = vadd.f32 %v202_v0, %v155_v3  ;;  %v480_v0 = vpop.permute.xlu0 %479 }
  0xcf   :  { %v188_v54 = vpop.permute.xlu1 %187 }
  0xd0   :  { %v203_v55 = vmul.f32 %v1242_v62, %v188_v54  ;;  %v980_v62 = vld [vmem:[%s1332_s4 + $0x8] sm:$0xff]  }
  0xd2   :  { %v211_v1 = vadd.f32 %v203_v55, %v156_v59  ;;  %v985_v55 = vld [vmem:[%s1334_s6 + $0x10] sm:$0xff]   ;;  %v987_v59 = vld [vmem:[%s1336_s8] sm:$0xff]  }
  0xd4   :  { %v248_v53 = vpop.permute.xlu1 %247  ;;  %v267_v6 = vadd.f32 %v258_v5, %v211_v1 }
  0xd5   :  { %v265_v4 = vadd.f32 %v248_v53, %v209_v2 }
  0xd6   :  { %v275_v12 = vmax.f32 %v267_v6, 0.0 }
  0xd7   :  { %v273_v8 = vmax.f32 %v265_v4, 0.0 }
  0xd8   :  { %v253_v10 = vpop.permute.xlu1 %252 }
  0xd9   :  { %v286_v48 = vpack.c.bf16 %v273_v8, %v272_v7  ;;  %v266_v11 = vadd.f32 %v253_v10, %v210_v9  ;;  %v490_v8 = vpop.permute.xlu0 %489 }
  0xdb   :  { %v274_v56 = vmax.f32 %v266_v11, 0.0  ;;  %902 = vmatprep.subr.bf16.mxu0 %v286_v48 }
  0xdc   :  { %903 = vmatpush3.bf16.msra.mxu0 %v286_v48  ;;  %v299_v16 = vpop.permute.xlu1 %298 }
  0xdd   :  { %v287_v57 = vpack.c.bf16 %v275_v12, %v274_v56 }
  0xdf   :  { %904 = vmatprep.subr.bf16.mxu0 %v287_v57 }
  0xe0   :  { %905 = vmatpush3.bf16.msra.mxu0 %v287_v57  ;;  %v309_v18 = vpop.permute.xlu1 %308 }
  0xe3   :  { %907 = vmatmul.mubr.msk.bf16.vlgmr.msra.gmra.mrb[0].mxu0 %vm356_vm0, %v980_v62 }
  0xe4   :  { %910 = vmatprep.mubr.msk.bf16.mxu0 %vm356_vm0, %v981_v13  ;;  %v319_v23 = vpop.permute.xlu1 %318 }
  0xe8   :  { %v329_v35 = vpop.permute.xlu1 %328 }
  0xeb   :  { %911 = vmatmul.mubr.msk.bf16.gmra.mrb[4].mxu0 %vm356_vm0, %v982_v14 }
  0xec   :  { %938 = vmatprep.mubr.msk.bf16.mxu0 %vm356_vm0, %v987_v59  ;;  %v465_v60 = vpop.permute.xlu1 %464 }
  0xf0   :  { %v475_v63 = vpop.permute.xlu1 %474 }
  0xf4   :  { %v485_v3 = vpop.permute.xlu1 %484 }
  0xf8   :  { %v495_v57 = vpop.permute.xlu1 %494 }
 0x1b6   :  { %v908_v20 = vpop.f32.mrb[0].mxu0 }
 0x1b7   :  { %v412_v21 = vadd.f32 %v908_v20, %v309_v18  ;;  %v403_v22 = vpop.f32.mrb[1].mxu0 }
 0x1b8   :  { %v404_v24 = vadd.f32 %v403_v22, %v299_v16  ;;  %v909_v25 = vpop.f32.mrb[2].mxu0  ;;  %v500_v16 = vpop.permute.xlu0 %499 }
 0x1b9   :  { %v415_v26 = vadd.f32 %v909_v25, %v314_v19  ;;  %v406_v27 = vpop.f32.mrb[3].mxu0  ;;  %v436_v30 = vmax.f32 %v412_v21, 0.0 }
 0x1ba   :  { %v407_v29 = vadd.f32 %v406_v27, %v304_v17  ;;  %v434_v32 = vmax.f32 %v404_v24, 0.0 }
 0x1bb   :  { %v437_v31 = vmax.f32 %v415_v26, 0.0 }
 0x1bc   :  { %v435_v33 = vmax.f32 %v407_v29, 0.0  ;;  %v989_v29 = vld [vmem:[%s1336_s8 + $0x10] sm:$0xff]  }
 0x1bd   :  { %v451_v34 = vpack.c.bf16 %v437_v31, %v436_v30  ;;  %v990_v30 = vld [vmem:[%s1336_s8 + $0x18] sm:$0xff]   ;;  %v1018_v31 = vmov 0.0  }
 0x1be   :  { %v912_v36 = vpop.f32.mrb[4].mxu0  ;;  %v450_v37 = vpack.c.bf16 %v435_v33, %v434_v32  ;;  %v630_v32 = vpop.permute.xlu1 %629 }
 0x1bf   :  { %v428_v38 = vadd.f32 %v912_v36, %v329_v35  ;;  %v419_v39 = vpop.f32.mrb[5].mxu0  ;;  %v635_v33 = vpop.permute.xlu0 %634 }
 0x1c0   :  { %v420_v41 = vadd.f32 %v419_v39, %v319_v23  ;;  %v913_v42 = vpop.f32.mrb[6].mxu0  ;;  %914 = vmatprep.subr.bf16.mxu1 %v450_v37 }
 0x1c1   :  { %v431_v43 = vadd.f32 %v913_v42, %v334_v40  ;;  %v422_v44 = vpop.f32.mrb[7].mxu0  ;;  %915 = vmatpush3.bf16.msra.mxu1 %v450_v37  ;;  %v440_v46 = vmax.f32 %v428_v38, 0.0 }
 0x1c2   :  { %v423_v45 = vadd.f32 %v422_v44, %v324_v28  ;;  %916 = vmatprep.subr.bf16.mxu1 %v451_v34  ;;  %v438_v49 = vmax.f32 %v420_v41, 0.0  ;;  %v988_v28 = vld [vmem:[%s1336_s8 + $0x8] sm:$0xff]  }
 0x1c3   :  { %v441_v47 = vmax.f32 %v431_v43, 0.0  ;;  %v645_v35 = vpop.permute.xlu0 %644 }
 0x1c4   :  { %v439_v50 = vmax.f32 %v423_v45, 0.0 }
 0x1c5   :  { %v453_v52 = vpack.c.bf16 %v441_v47, %v440_v46  ;;  %917 = vmatpush3.bf16.msra.mxu1 %v451_v34  ;;  %v640_v34 = vpop.permute.xlu1 %639 }
 0x1c6   :  { %v452_v54 = vpack.c.bf16 %v439_v50, %v438_v49 }
 0x1c7   :  { %v655_v44 = vpop.permute.xlu0 %654 }
 0x1c8   :  { %918 = vmatprep.subr.bf16.mxu1 %v452_v54 }
 0x1c9   :  { %919 = vmatpush3.bf16.msra.mxu1 %v452_v54  ;;  %v650_v39 = vpop.permute.xlu1 %649 }
 0x1ca   :  { %920 = vmatprep.subr.bf16.mxu1 %v453_v52 }
 0x1cd   :  { %921 = vmatpush3.bf16.msra.mxu1 %v453_v52  ;;  %v660_v54 = vpop.permute.xlu1 %659 }
 0x1ce   :  { %946 = vmatprep.subr.bf16.mxu1 %v1018_v31 }
 0x1d0   :  { %923 = vmatmul.mubr.msk.bf16.vlgmr.msra.gmra.mrb[0].mxu1 %vm356_vm0, %v984_v51 }
 0x1d1   :  { %926 = vmatprep.mubr.msk.bf16.mxu1 %vm356_vm0, %v985_v55 }
 0x1d8   :  { %927 = vmatmul.mubr.msk.bf16.gmra.mrb[4].mxu1 %vm356_vm0, %v986_v58 }
 0x1d9   :  { %954 = vmatprep.mubr.msk.bf16.mxu1 %vm1019_vm1, %v1018_v31 }
 0x2a3   :  { %v924_v1 = vpop.f32.mrb[0].mxu1 }
 0x2a4   :  { %v577_v2 = vadd.f32 %v924_v1, %v475_v63  ;;  %v568_v53 = vpop.f32.mrb[1].mxu1 }
 0x2a5   :  { %v569_v4 = vadd.f32 %v568_v53, %v465_v60  ;;  %v925_v5 = vpop.f32.mrb[2].mxu1  ;;  %v665_v60 = vpop.permute.xlu0 %664 }
 0x2a6   :  { %v580_v6 = vadd.f32 %v925_v5, %v480_v0  ;;  %v571_v7 = vpop.f32.mrb[3].mxu1  ;;  %v601_v10 = vmax.f32 %v577_v2, 0.0 }
 0x2a7   :  { %v572_v9 = vadd.f32 %v571_v7, %v470_v61  ;;  %v599_v11 = vmax.f32 %v569_v4, 0.0 }
 0x2a8   :  { %v602_v48 = vmax.f32 %v580_v6, 0.0 }
 0x2a9   :  { %v600_v12 = vmax.f32 %v572_v9, 0.0  ;;  %v781_v9 = vpop.permute.xlu1 %780 }
 0x2aa   :  { %v616_v56 = vpack.c.bf16 %v602_v48, %v601_v10 }
 0x2ab   :  { %v615_v62 = vpack.c.bf16 %v600_v12, %v599_v11  ;;  %v928_v13 = vpop.f32.mrb[4].mxu1 }
 0x2ac   :  { %v593_v14 = vadd.f32 %v928_v13, %v495_v57  ;;  %v584_v15 = vpop.f32.mrb[5].mxu1 }
 0x2ad   :  { %v585_v17 = vadd.f32 %v584_v15, %v485_v3  ;;  %v929_v18 = vpop.f32.mrb[6].mxu1  ;;  %930 = vmatprep.subr.bf16.mxu0 %v615_v62 }
 0x2ae   :  { %v596_v19 = vadd.f32 %v929_v18, %v500_v16  ;;  %v587_v20 = vpop.f32.mrb[7].mxu1  ;;  %931 = vmatpush3.bf16.msra.mxu0 %v615_v62  ;;  %v605_v22 = vmax.f32 %v593_v14, 0.0 }
 0x2af   :  { %v588_v21 = vadd.f32 %v587_v20, %v490_v8  ;;  %932 = vmatprep.subr.bf16.mxu0 %v616_v56  ;;  %v603_v24 = vmax.f32 %v585_v17, 0.0  ;;  %v772_v8 = vld [vmem:[%s1338_s10] sm:$0x1] }
 0x2b0   :  { %v606_v23 = vmax.f32 %v596_v19, 0.0 }
 0x2b1   :  { %v604_v25 = vmax.f32 %v588_v21, 0.0 }
 0x2b2   :  { %v618_v26 = vpack.c.bf16 %v606_v23, %v605_v22  ;;  %933 = vmatpush3.bf16.msra.mxu0 %v616_v56 }
 0x2b3   :  { %v617_v27 = vpack.c.bf16 %v604_v25, %v603_v24 }
 0x2b5   :  { %934 = vmatprep.subr.bf16.mxu0 %v617_v27 }
 0x2b6   :  { %935 = vmatpush3.bf16.msra.mxu0 %v617_v27 }
 0x2b7   :  { %936 = vmatprep.subr.bf16.mxu0 %v618_v26 }
 0x2ba   :  { %937 = vmatpush3.bf16.msra.mxu0 %v618_v26 }
 0x2bd   :  { %939 = vmatmul.mubr.msk.bf16.vlgmr.msra.gmra.mrb[8].mxu0 %vm356_vm0, %v988_v28 }
 0x2be   :  { %942 = vmatprep.mubr.msk.bf16.mxu0 %vm356_vm0, %v989_v29 }
 0x2c5   :  { %943 = vmatmul.mubr.msk.bf16.gmra.mrb[12].mxu0 %vm356_vm0, %v990_v30 }
 0x390   :  { %v940_v36 = vpop.f32.mrb[8].mxu0 }
 0x391   :  { %v742_v37 = vadd.f32 %v940_v36, %v640_v34  ;;  %v733_v38 = vpop.f32.mrb[9].mxu0 }
 0x392   :  { %v734_v40 = vadd.f32 %v733_v38, %v630_v32  ;;  %v941_v41 = vpop.f32.mrb[10].mxu0 }
 0x393   :  { %v745_v42 = vadd.f32 %v941_v41, %v645_v35  ;;  %v736_v43 = vpop.f32.mrb[11].mxu0  ;;  %v766_v46 = vmax.f32 %v742_v37, 0.0 }
 0x394   :  { %v737_v45 = vadd.f32 %v736_v43, %v635_v33  ;;  %v764_v49 = vmax.f32 %v734_v40, 0.0 }
 0x395   :  { %v767_v47 = vmax.f32 %v745_v42, 0.0 }
 0x396   :  { %v765_v50 = vmax.f32 %v737_v45, 0.0 }
 0x397   :  { %v774_v52 = vpack.c.bf16 %v767_v47, %v766_v46 }
 0x398   :  { %v773_v51 = vpack.c.bf16 %v765_v50, %v764_v49  ;;  %v944_v55 = vpop.f32.mrb[12].mxu0 }
 0x399   :  { %v758_v58 = vadd.f32 %v944_v55, %v660_v54  ;;  %v749_v59 = vpop.f32.mrb[13].mxu0 }
 0x39a   :  { %v750_v61 = vadd.f32 %v749_v59, %v650_v39  ;;  %v945_v63 = vpop.f32.mrb[14].mxu0  ;;  %947 = vmatpush3.bf16.msra.mxu1 %v773_v51 }
 0x39b   :  { %v761_v0 = vadd.f32 %v945_v63, %v665_v60  ;;  %v752_v1 = vpop.f32.mrb[15].mxu0  ;;  %948 = vmatprep.subr.bf16.mxu1 %v1018_v31  ;;  %v770_v53 = vmax.f32 %v758_v58, 0.0 }
 0x39c   :  { %v753_v2 = vadd.f32 %v752_v1, %v655_v44  ;;  %v768_v4 = vmax.f32 %v750_v61, 0.0 }
 0x39d   :  { %v771_v3 = vmax.f32 %v761_v0, 0.0 }
 0x39e   :  { %v769_v5 = vmax.f32 %v753_v2, 0.0  ;;  %949 = vmatpush3.bf16.msra.mxu1 %v774_v52 }
 0x39f   :  { %v776_v6 = vpack.c.bf16 %v771_v3, %v770_v53  ;;  %950 = vmatprep.subr.bf16.mxu1 %v1018_v31 }
 0x3a0   :  { %v775_v7 = vpack.c.bf16 %v769_v5, %v768_v4 }
 0x3a2   :  { %951 = vmatpush3.bf16.msra.mxu1 %v775_v7 }
 0x3a3   :  { %952 = vmatprep.subr.bf16.mxu1 %v1018_v31 }
 0x3a6   :  { %953 = vmatpush3.bf16.msra.mxu1 %v776_v6 }
 0x3a9   :  { %955 = vmatmul.mubr.msk.bf16.vlgmr.msra.gmra.mrb[8].mxu1 %vm356_vm0, %v772_v8 }
 0x47c   :  { %v820_v10 = vpop.f32.mrb[8].mxu1 }
 0x47d   :  { %v821_v48 = vadd.f32 %v820_v10, %v781_v9  ;;  %v956_v11 = vpop.f32.mrb[9].mxu1 }
 0x47e   :  { %v823_v12 = vpop.f32.mrb[10].mxu1 }
 0x47f   :  { %826 = vst [vmem:[#allocation2] sm:$0x3] %v821_v48  ;;  %v957_v56 = vpop.f32.mrb[11].mxu1 }
 0x480   :  { %1002 = shalt.err (!%p999_p4)
}
 0x481   :  { %s1003_s2 = scalar_lea.hbm %s1340_s12, 32 }
 0x482   :  { %p1004_p5 = scmp.ne.s32.totalorder %s1340_s12, %s1003_s2  ;;  %p1007_p6 = scmp.lt.u32.totalorder %s1003_s2, %s1340_s12 }
 0x484   :  { %p1009_p7 = pnand %p1007_p6, %p1004_p5 }
 0x486   :  { %1012 = shalt.err (!%p1009_p7)
}
 0x487   :  { %836 = dma.vmem_to_hbm [thread:$0]  %s834_s9, 32, %s1340_s12, [#allocation3]  }
 0x488   :  { %1013 = dma.done.wait [#allocation3], 32  }
 0x489   :  { %1014 = vsyncadd [#allocation3], 4294967264 }
 0x48a   :  { %840 = vsyncpa [#allocation3], 1 }

</bundles_post_ra>
